<compile_context>
chip_gen: v7x
topology: tpu7x:2x2x1
jax: 0.10.0
libtpu: 0.0.40
codegen_flags: <defaults>
</compile_context>

<pallas_src>
import math
from functools import partial

import numpy as np
import jax
import jax.numpy as jnp
from jax.experimental import pallas as pl
from jax.experimental.pallas import tpu as pltpu

ROI_OUTPUT_SIZE = 7
SAMPLING_RATIO = 2
HIDDEN = 128            # FastRCNNHead defaults to 1024; small value for this synthetic test
NUM_CLASSES = 1         # single-class head
CONF_THRESHOLD = 0.05
NMS_THRESHOLD = 0.5
KEEP_TOP_N = 100

LANES = 128
OUT_PAD = 128                               # lane-dense packed output width
ROI_PAD = 128                               # lane-dense proposal slab width
_BBOX_XFORM_CLIP = math.log(1000.0 / 16.0)  # torchvision-style dw/dh clamp


def _round_up(a, b):
    return ((a + b - 1) // b) * b


# ----------------------------------------------------------------------------
# ROI Align (torchvision-style, aligned=False) -- gather-heavy, kept in plain JAX,
# in channels-LAST layout so each bilinear corner gather pulls a contiguous
# C-vector along the 128-lane axis.
# TODO(synk): data-dependent bilinear gather (MultiScaleRoIAlign) has no clean
#             rectangular-BlockSpec Pallas mapping; kept as JAX glue (fused under jit).
# ----------------------------------------------------------------------------
def _bilinear_sample_hwc(fmap_hwc, y, x):
    # fmap_hwc: (H, W, C); y, x: (N, M) float coords
    H, W, C = fmap_hwc.shape
    valid = (y >= -1.0) & (y <= H) & (x >= -1.0) & (x <= W)
    y = jnp.maximum(y, 0.0)
    x = jnp.maximum(x, 0.0)
    y_low = jnp.minimum(jnp.floor(y).astype(jnp.int32), H - 1)
    x_low = jnp.minimum(jnp.floor(x).astype(jnp.int32), W - 1)
    y_high = jnp.minimum(y_low + 1, H - 1)
    x_high = jnp.minimum(x_low + 1, W - 1)
    y = jnp.minimum(y, float(H - 1))
    x = jnp.minimum(x, float(W - 1))
    ly = y - y_low.astype(y.dtype)
    lx = x - x_low.astype(x.dtype)
    hy = 1.0 - ly
    hx = 1.0 - lx
    v1 = fmap_hwc[y_low, x_low]       # (N, M, C) channels-last gather
    v2 = fmap_hwc[y_low, x_high]
    v3 = fmap_hwc[y_high, x_low]
    v4 = fmap_hwc[y_high, x_high]
    val = (hy * hx)[..., None] * v1 + (hy * lx)[..., None] * v2 \
        + (ly * hx)[..., None] * v3 + (ly * lx)[..., None] * v4
    val = jnp.where(valid[..., None], val, 0.0)
    return val                         # (N, M, C)


def roi_align(fmap_hwc, rois, output_size=ROI_OUTPUT_SIZE, sampling_ratio=SAMPLING_RATIO,
              spatial_scale=1.0):
    # fmap_hwc: (H, W, C); rois: (N, 4) -> pooled (N, C, P, P)
    N = rois.shape[0]
    P, S = output_size, sampling_ratio
    x1 = rois[:, 0] * spatial_scale
    y1 = rois[:, 1] * spatial_scale
    x2 = rois[:, 2] * spatial_scale
    y2 = rois[:, 3] * spatial_scale
    roi_w = jnp.maximum(x2 - x1, 1.0)
    roi_h = jnp.maximum(y2 - y1, 1.0)
    bin_w = roi_w / P
    bin_h = roi_h / P
    p = jnp.arange(P, dtype=jnp.float32)
    s = jnp.arange(S, dtype=jnp.float32)
    ys = y1[:, None, None] + p[None, :, None] * bin_h[:, None, None] + \
        (s[None, None, :] + 0.5) * bin_h[:, None, None] / S
    xs = x1[:, None, None] + p[None, :, None] * bin_w[:, None, None] + \
        (s[None, None, :] + 0.5) * bin_w[:, None, None] / S
    Y = jnp.broadcast_to(ys[:, :, None, :, None], (N, P, P, S, S)).reshape(N, -1)
    X = jnp.broadcast_to(xs[:, None, :, None, :], (N, P, P, S, S)).reshape(N, -1)
    vals = _bilinear_sample_hwc(fmap_hwc, Y, X)                     # (N, P*P*S*S, C)
    C = fmap_hwc.shape[-1]
    vals = vals.reshape(N, P, P, S, S, C).mean(axis=(3, 4))         # (N, P, P, C)
    return jnp.transpose(vals, (0, 3, 1, 2))                        # (N, C, P, P)


# ----------------------------------------------------------------------------
# Pallas kernel: hidden MLP + fused cls/reg head + sigmoid + box decode.
# One lane-dense (TR, 128) packed f32 output slab:
#   lane 0      : cls logit
#   lanes 1..4  : raw reg deltas (dx, dy, dw, dh)
#   lane 5      : sigmoid score
#   lanes 6..9  : decoded box (x1, y1, x2, y2)
#   lanes 10..  : zero padding (already zero in `head` — no explicit pad slab)
# ----------------------------------------------------------------------------
def _head_kernel(x_ref, rois_ref, w1_ref, b1_ref, w2_ref, b2_ref, wh_ref, bh_ref,
                 out_ref):
    x = x_ref[...]                                                     # (TR, K_pad) bf16
    h1 = jnp.maximum(
        jnp.dot(x, w1_ref[...], preferred_element_type=jnp.float32) + b1_ref[...], 0.0)
    h2 = jnp.maximum(
        jnp.dot(h1.astype(jnp.bfloat16), w2_ref[...],
                preferred_element_type=jnp.float32) + b2_ref[...], 0.0)
    # fused cls+reg head: single (H, 128) matmul, lane-dense result.
    head = jnp.dot(h2.astype(jnp.bfloat16), wh_ref[...],
                   preferred_element_type=jnp.float32) + bh_ref[...]   # (TR, 128) f32

    # head already has logit in lane 0, deltas in lanes 1..4, zeros in lanes 5..127
    # (wh/bh are zero-padded there) -> store it once, then patch narrow lanes below.
    out_ref[...] = head

    logits = head[:, 0:1]
    scores = jax.nn.sigmoid(logits)

    # offsets2boxes: standard Faster-RCNN decode against the proposal boxes.
    # TODO(synk): assumes unit BoxCoder weights (reference offsets2boxes not provided).
    rois = rois_ref[...]                                 # (TR, 128) f32, data in lanes 0..3
    rw = rois[:, 2:3] - rois[:, 0:1]
    rh = rois[:, 3:4] - rois[:, 1:2]
    cx = rois[:, 0:1] + 0.5 * rw
    cy = rois[:, 1:2] + 0.5 * rh
    dx = head[:, 1:2]
    dy = head[:, 2:3]
    dw = jnp.minimum(head[:, 3:4], _BBOX_XFORM_CLIP)     # avoid exp overflow
    dh = jnp.minimum(head[:, 4:5], _BBOX_XFORM_CLIP)
    pcx = dx * rw + cx
    pcy = dy * rh + cy
    pw = jnp.exp(dw) * rw
    ph = jnp.exp(dh) * rh

    # narrow masked stores (VMEM-local); HBM writeback stays a full lane-dense block.
    out_ref[:, 5:6] = scores
    out_ref[:, 6:7] = pcx - 0.5 * pw
    out_ref[:, 7:8] = pcy - 0.5 * ph
    out_ref[:, 8:9] = pcx + 0.5 * pw
    out_ref[:, 9:10] = pcy + 0.5 * ph


# ----------------------------------------------------------------------------
# One-time weight packing (hoisted out of the forward path): bf16 casts,
# K-padding of w1 and cls/reg head fusion into one (H, 128) lane-dense weight.
# ----------------------------------------------------------------------------
def pack_params(params):
    in_features, H = params["w1"].shape
    K_pad = _round_up(in_features, LANES)                # e.g. 196 -> 256
    # TODO(synk): at production size (in_features=12544, hidden=1024) w1 should be
    #             K-tiled with an "arbitrary" grid axis + f32 accumulator scratch and
    #             pl.when init/finalize on v7x (resident bf16 w1 alone is ~25 MB, past
    #             its 32 MiB default scoped VMEM); on v5e/v6e keep it resident and
    #             raise vmem_limit_bytes instead.  At these toy sizes it is resident.
    w1 = jnp.zeros((K_pad, H), jnp.bfloat16).at[:in_features].set(
        params["w1"].astype(jnp.bfloat16))
    wh = jnp.zeros((H, OUT_PAD), jnp.bfloat16)
    wh = wh.at[:, 0:1].set(params["wc"].astype(jnp.bfloat16))
    wh = wh.at[:, 1:5].set(params["wr"].astype(jnp.bfloat16))
    bh = jnp.zeros((1, OUT_PAD), jnp.float32)
    bh = bh.at[:, 0:1].set(params["bc"].astype(jnp.float32))
    bh = bh.at[:, 1:5].set(params["br"].astype(jnp.float32))
    return {
        "w1": w1,
        "b1": params["b1"].astype(jnp.float32),
        "w2": params["w2"].astype(jnp.bfloat16),
        "b2": params["b2"].astype(jnp.float32),
        "wh": wh,
        "bh": bh,
    }


def fastrcnn_head_pallas(x, rois_all, packed, *, row_tile=512):
    """x: (R, C*P*P) pooled+flattened features; rois_all: (R, 4) proposals.

    Returns f32 arrays: cls_logits (R,1), reg_deltas (R,4), scores (R,1), boxes (R,4).
    """
    R, K = x.shape
    K_pad, H = packed["w1"].shape
    assert K <= K_pad

    # Row tile: as large as row_tile to amortize the ~0.35 us per-grid-step overhead,
    # but capped so the "parallel" row axis gets >= 2 grid steps whenever R allows
    # (both v7x TensorCores fed); TR stays a multiple of 8.
    TR = max(8, min(row_tile, _round_up(pl.cdiv(max(R, 1), 2), 8)))
    R_pad = _round_up(max(R, 1), TR)

    # bf16 activations (f32 MXU accumulation in-kernel), lane-dense f32 proposal slab.
    # Under jit these pads/casts fuse with the ROI-align producer.
    x_p = jnp.zeros((R_pad, K_pad), jnp.bfloat16).at[:R, :K].set(x.astype(jnp.bfloat16))
    rois_p = jnp.zeros((R_pad, ROI_PAD), jnp.float32).at[:R, :4].set(
        rois_all.astype(jnp.float32))

    grid = (R_pad // TR,)
    flops = 2 * R_pad * (K_pad * H + H * H + H * OUT_PAD)
    bytes_accessed = (x_p.size * 2 + rois_p.size * 4
                      + packed["w1"].size * 2 + packed["w2"].size * 2
                      + packed["wh"].size * 2
                      + (packed["b1"].size + packed["b2"].size + packed["bh"].size) * 4
                      + R_pad * OUT_PAD * 4)

    packed_out = pl.pallas_call(
        _head_kernel,
        out_shape=jax.ShapeDtypeStruct((R_pad, OUT_PAD), jnp.float32),
        grid=grid,
        in_specs=[
            pl.BlockSpec((TR, K_pad), lambda i: (i, 0)),     # x rows: pipelined over R
            pl.BlockSpec((TR, ROI_PAD), lambda i: (i, 0)),   # lane-dense proposal rows
            pl.BlockSpec((K_pad, H), lambda i: (0, 0)),      # weights stay VMEM-resident
            pl.BlockSpec((1, H), lambda i: (0, 0)),
            pl.BlockSpec((H, H), lambda i: (0, 0)),
            pl.BlockSpec((1, H), lambda i: (0, 0)),
            pl.BlockSpec((H, OUT_PAD), lambda i: (0, 0)),
            pl.BlockSpec((1, OUT_PAD), lambda i: (0, 0)),
        ],
        out_specs=pl.BlockSpec((TR, OUT_PAD), lambda i: (i, 0)),
        compiler_params=pltpu.CompilerParams(
            dimension_semantics=("parallel",)),              # megacore-shardable row axis
        cost_estimate=pl.CostEstimate(
            flops=int(flops),
            transcendentals=int(3 * R_pad),                  # sigmoid + 2x exp per row
            bytes_accessed=int(bytes_accessed)),
    )(x_p, rois_p, packed["w1"], packed["b1"], packed["w2"], packed["b2"],
      packed["wh"], packed["bh"])

    packed_out = packed_out[:R]
    cls_logits = packed_out[:, 0:1]
    reg_deltas = packed_out[:, 1:5]
    scores = packed_out[:, 5:6]
    boxes = packed_out[:, 6:10]
    return cls_logits, reg_deltas, scores, boxes


# ----------------------------------------------------------------------------
# Jitted device path: ROI-Align gather -> flatten -> pad/cast -> Pallas head.
# ----------------------------------------------------------------------------
@partial(jax.jit, static_argnames=("row_tile",))
def _device_forward(fmap_hwc, rois_list, spatial_scales, packed, *, row_tile=512):
    pooled_list = []
    for b, boxes in enumerate(rois_list):
        pooled = roi_align(fmap_hwc[b], boxes, spatial_scale=spatial_scales[b])  # (N,C,P,P)
        pooled_list.append(pooled.reshape(boxes.shape[0], -1))   # == flatten(start_dim=1)
    x = jnp.concatenate(pooled_list, axis=0).astype(jnp.float32)          # (R, C*P*P)
    rois_all = jnp.concatenate(rois_list, axis=0).astype(jnp.float32)     # (R, 4)
    return fastrcnn_head_pallas(x, rois_all, packed, row_tile=row_tile)


# ----------------------------------------------------------------------------
# Post-processing (dynamic shapes) -- numpy glue.
# TODO(synk): NMS / top-k / boolean-mask filtering are dynamic-shape ops with no
#             clean Pallas equivalent; implemented in numpy after the kernel.
# TODO(synk): training path (build_targets / sample_fg_bg / losses) depends on
#             functions not provided in the module; only the targets=None path exists.
# ----------------------------------------------------------------------------
def _nms(boxes, scores, iou_threshold):
    order = np.argsort(-scores)
    keep = []
    while order.size > 0:
        i = order[0]
        keep.append(i)
        if order.size == 1:
            break
        rest = order[1:]
        xx1 = np.maximum(boxes[i, 0], boxes[rest, 0])
        yy1 = np.maximum(boxes[i, 1], boxes[rest, 1])
        xx2 = np.minimum(boxes[i, 2], boxes[rest, 2])
        yy2 = np.minimum(boxes[i, 3], boxes[rest, 3])
        inter = np.maximum(xx2 - xx1, 0.0) * np.maximum(yy2 - yy1, 0.0)
        area_i = (boxes[i, 2] - boxes[i, 0]) * (boxes[i, 3] - boxes[i, 1])
        area_r = (boxes[rest, 2] - boxes[rest, 0]) * (boxes[rest, 3] - boxes[rest, 1])
        iou = inter / np.maximum(area_i + area_r - inter, 1e-12)
        order = rest[iou <= iou_threshold]
    return np.asarray(keep, dtype=np.int64)


def post_process(scores_all, boxes_all, roi_counts):
    batched_dets = []
    current = 0
    for n in roi_counts:
        if n == 0:
            batched_dets.append(np.zeros((0, 6), dtype=np.float32))
            continue
        scores = scores_all[current:current + n]
        boxes = boxes_all[current:current + n]
        current += n
        preds = (scores >= 0.5).astype(np.int64)
        fg = preds != 0
        scores, preds, boxes = scores[fg], preds[fg], boxes[fg]
        keep = scores >= CONF_THRESHOLD
        scores, preds, boxes = scores[keep], preds[keep], boxes[keep]
        ws = boxes[:, 2] - boxes[:, 0]
        hs = boxes[:, 3] - boxes[:, 1]
        keep = (ws >= 1e-3) & (hs >= 1e-3)
        scores, preds, boxes = scores[keep], preds[keep], boxes[keep]
        if scores.size > 0:
            keep = _nms(boxes, scores, NMS_THRESHOLD)      # single class -> plain NMS
            scores, preds, boxes = scores[keep], preds[keep], boxes[keep]
        keep_n = min(KEEP_TOP_N, scores.shape[0])
        sel = np.argsort(-scores)[:keep_n]
        scores, preds, boxes = scores[sel], preds[sel], boxes[sel]
        dets = np.concatenate(
            [boxes, scores[:, None], preds[:, None].astype(boxes.dtype)], axis=-1)
        batched_dets.append(dets)
    return batched_dets


# ----------------------------------------------------------------------------
# Full forward (inference): ROI-pool -> Pallas head kernel -> post-process
# ----------------------------------------------------------------------------
def fastrcnn_single_head_forward(fmaps, rois, img_dims, packed_params, *, row_tile=512):
    fmap = fmaps["0"]                                     # (B, C, H, W), NCHW
    fmap_hwc = jnp.transpose(fmap, (0, 2, 3, 1))          # channels-last for the gather
    spatial_scales = tuple(fmap.shape[-1] / float(d[1]) for d in img_dims)

    cls_logits, reg_deltas, scores, boxes = _device_forward(
        fmap_hwc, list(rois), spatial_scales, packed_params, row_tile=row_tile)

    roi_counts = [int(r.shape[0]) for r in rois]
    batched_dets = post_process(np.asarray(scores)[:, 0], np.asarray(boxes), roi_counts)
    reg_deltas = reg_deltas.reshape(-1, NUM_CLASSES, 4)   # matches reshape(-1, num_classes, 4)
    return batched_dets, cls_logits, reg_deltas


def init_params(key, in_features, hidden, num_classes):
    ks = jax.random.split(key, 8)
    scale = 0.05
    return {
        "w1": scale * jax.random.normal(ks[0], (in_features, hidden), jnp.float32),
        "b1": scale * jax.random.normal(ks[1], (1, hidden), jnp.float32),
        "w2": scale * jax.random.normal(ks[2], (hidden, hidden), jnp.float32),
        "b2": scale * jax.random.normal(ks[3], (1, hidden), jnp.float32),
        "wc": scale * jax.random.normal(ks[4], (hidden, num_classes), jnp.float32),
        "bc": scale * jax.random.normal(ks[5], (1, num_classes), jnp.float32),
        "wr": scale * jax.random.normal(ks[6], (hidden, num_classes * 4), jnp.float32),
        "br": scale * jax.random.normal(ks[7], (1, num_classes * 4), jnp.float32),
    }


if __name__ == "__main__":
    key = jax.random.PRNGKey(0)
    B, C, Hf, Wf = 2, 4, 16, 16
    n_rois = 8
    img_dims = [(Hf, Wf)] * B

    k_fmap, k_roi, k_par = jax.random.split(key, 3)
    fmaps = {"0": jax.random.normal(k_fmap, (B, C, Hf, Wf), jnp.float32)}

    # deterministic proposal boxes (x1, y1, x2, y2) inside the 16x16 image
    rois = []
    rk = jax.random.split(k_roi, B)
    for b in range(B):
        k1, k2 = jax.random.split(rk[b])
        xy1 = jax.random.uniform(k1, (n_rois, 2), minval=0.0, maxval=9.0)
        wh = jax.random.uniform(k2, (n_rois, 2), minval=2.0, maxval=6.0)
        rois.append(jnp.concatenate([xy1, xy1 + wh], axis=-1).astype(jnp.float32))

    in_features = C * ROI_OUTPUT_SIZE * ROI_OUTPUT_SIZE
    params = init_params(k_par, in_features, HIDDEN, NUM_CLASSES)
    packed_params = pack_params(params)                   # one-time weight packing

    batched_dets, cls_logits, reg_deltas = fastrcnn_single_head_forward(
        fmaps, rois, img_dims, packed_params)
    jax.block_until_ready((cls_logits, reg_deltas))

    # sanity checks on shapes
    R = B * n_rois
    assert cls_logits.shape == (R, NUM_CLASSES)
    assert reg_deltas.shape == (R, NUM_CLASSES, 4)
    assert len(batched_dets) == B
    for d in batched_dets:
        assert d.ndim == 2 and d.shape[1] == 6
    print("KERNEL_OK")
</pallas_src>

<mosaic_0001>
module attributes {stable_mosaic.version = 11 : i64} {
  func.func @_head_kernel(%arg0: i32, %arg1: memref<8x256xbf16, #tpu.memory_space<vmem>>, %arg2: memref<8x128xf32, #tpu.memory_space<vmem>>, %arg3: memref<256x128xbf16, #tpu.memory_space<vmem>>, %arg4: memref<1x128xf32, #tpu.memory_space<vmem>>, %arg5: memref<128x128xbf16, #tpu.memory_space<vmem>>, %arg6: memref<1x128xf32, #tpu.memory_space<vmem>>, %arg7: memref<128x128xbf16, #tpu.memory_space<vmem>>, %arg8: memref<1x128xf32, #tpu.memory_space<vmem>>, %arg9: memref<8x128xf32, #tpu.memory_space<vmem>>) attributes {dimension_semantics = [#tpu.dimension_semantics<parallel>], iteration_bounds = array<i64: 2>, scalar_prefetch = 0 : i64, scratch_operands = 0 : i64, tpu.core_type = #tpu.core_type<tc>, window_params = [{transform_indices = @transform_0, window_bounds = array<i64: 8, 256>}, {transform_indices = @transform_1, window_bounds = array<i64: 8, 128>}, {pipeline_mode = #tpu.pipeline_mode<synchronous>, transform_indices = @transform_2, window_bounds = array<i64: 256, 128>}, {pipeline_mode = #tpu.pipeline_mode<synchronous>, transform_indices = @transform_3, window_bounds = array<i64: 1, 128>}, {pipeline_mode = #tpu.pipeline_mode<synchronous>, transform_indices = @transform_4, window_bounds = array<i64: 128, 128>}, {pipeline_mode = #tpu.pipeline_mode<synchronous>, transform_indices = @transform_5, window_bounds = array<i64: 1, 128>}, {pipeline_mode = #tpu.pipeline_mode<synchronous>, transform_indices = @transform_6, window_bounds = array<i64: 128, 128>}, {pipeline_mode = #tpu.pipeline_mode<synchronous>, transform_indices = @transform_7, window_bounds = array<i64: 1, 128>}, {transform_indices = @transform_8, window_bounds = array<i64: 8, 128>}]} {
    %c0 = arith.constant 0 : index
    %c0_0 = arith.constant 0 : index
    %0 = vector.load %arg1[%c0, %c0_0] : memref<8x256xbf16, #tpu.memory_space<vmem>>, vector<8x256xbf16>
    %c0_1 = arith.constant 0 : index
    %c0_2 = arith.constant 0 : index
    %1 = vector.load %arg3[%c0_1, %c0_2] : memref<256x128xbf16, #tpu.memory_space<vmem>>, vector<256x128xbf16>
    %cst = arith.constant dense<0.000000e+00> : vector<8x128xf32>
    %2 = tpu.matmul %0, %1, %cst {dimension_numbers = #tpu.dot_dimension_numbers<[1], [0], [0], [1], [0, 0, 1, 1], [], []>} : vector<8x256xbf16>, vector<256x128xbf16>, vector<8x128xf32> -> vector<8x128xf32>
    %c0_3 = arith.constant 0 : index
    %c0_4 = arith.constant 0 : index
    %3 = vector.load %arg4[%c0_3, %c0_4] : memref<1x128xf32, #tpu.memory_space<vmem>>, vector<1x128xf32>
    %4 = vector.broadcast %3 : vector<1x128xf32> to vector<8x128xf32>
    %5 = arith.addf %2, %4 : vector<8x128xf32>
    %cst_5 = arith.constant 0.000000e+00 : f32
    %6 = vector.broadcast %cst_5 : f32 to vector<8x128xf32>
    %7 = arith.maximumf %5, %6 : vector<8x128xf32>
    %8 = arith.truncf %7 : vector<8x128xf32> to vector<8x128xbf16>
    %c0_6 = arith.constant 0 : index
    %c0_7 = arith.constant 0 : index
    %9 = vector.load %arg5[%c0_6, %c0_7] : memref<128x128xbf16, #tpu.memory_space<vmem>>, vector<128x128xbf16>
    %cst_8 = arith.constant dense<0.000000e+00> : vector<8x128xf32>
    %10 = tpu.matmul %8, %9, %cst_8 {dimension_numbers = #tpu.dot_dimension_numbers<[1], [0], [0], [1], [0, 0, 1, 1], [], []>} : vector<8x128xbf16>, vector<128x128xbf16>, vector<8x128xf32> -> vector<8x128xf32>
    %c0_9 = arith.constant 0 : index
    %c0_10 = arith.constant 0 : index
    %11 = vector.load %arg6[%c0_9, %c0_10] : memref<1x128xf32, #tpu.memory_space<vmem>>, vector<1x128xf32>
    %12 = vector.broadcast %11 : vector<1x128xf32> to vector<8x128xf32>
    %13 = arith.addf %10, %12 : vector<8x128xf32>
    %cst_11 = arith.constant 0.000000e+00 : f32
    %14 = vector.broadcast %cst_11 : f32 to vector<8x128xf32>
    %15 = arith.maximumf %13, %14 : vector<8x128xf32>
    %16 = arith.truncf %15 : vector<8x128xf32> to vector<8x128xbf16>
    %c0_12 = arith.constant 0 : index
    %c0_13 = arith.constant 0 : index
    %17 = vector.load %arg7[%c0_12, %c0_13] : memref<128x128xbf16, #tpu.memory_space<vmem>>, vector<128x128xbf16>
    %cst_14 = arith.constant dense<0.000000e+00> : vector<8x128xf32>
    %18 = tpu.matmul %16, %17, %cst_14 {dimension_numbers = #tpu.dot_dimension_numbers<[1], [0], [0], [1], [0, 0, 1, 1], [], []>} : vector<8x128xbf16>, vector<128x128xbf16>, vector<8x128xf32> -> vector<8x128xf32>
    %c0_15 = arith.constant 0 : index
    %c0_16 = arith.constant 0 : index
    %19 = vector.load %arg8[%c0_15, %c0_16] : memref<1x128xf32, #tpu.memory_space<vmem>>, vector<1x128xf32>
    %20 = vector.broadcast %19 : vector<1x128xf32> to vector<8x128xf32>
    %21 = arith.addf %18, %20 : vector<8x128xf32>
    %c0_17 = arith.constant 0 : index
    %c0_18 = arith.constant 0 : index
    %22 = vector.load %arg9[%c0_17, %c0_18] : memref<8x128xf32, #tpu.memory_space<vmem>>, vector<8x128xf32>
    tpu.vector_store %arg9[%c0_17, %c0_18], %21 {strides = array<i32>} : memref<8x128xf32, #tpu.memory_space<vmem>>, vector<8x128xf32>,
    %23 = vector.extract_strided_slice %21 {offsets = [0, 0], sizes = [8, 1], strides = [1, 1]} : vector<8x128xf32> to vector<8x1xf32>
    %24 = arith.negf %23 : vector<8x1xf32>
    %25 = math.exp %24 : vector<8x1xf32>
    %cst_19 = arith.constant 1.000000e+00 : f32
    %26 = vector.broadcast %cst_19 : f32 to vector<8x1xf32>
    %27 = arith.addf %26, %25 : vector<8x1xf32>
    %28 = arith.divf %26, %27 : vector<8x1xf32>
    %c0_20 = arith.constant 0 : index
    %c0_21 = arith.constant 0 : index
    %29 = vector.load %arg2[%c0_20, %c0_21] : memref<8x128xf32, #tpu.memory_space<vmem>>, vector<8x128xf32>
    %30 = vector.extract_strided_slice %29 {offsets = [0, 2], sizes = [8, 1], strides = [1, 1]} : vector<8x128xf32> to vector<8x1xf32>
    %31 = vector.extract_strided_slice %29 {offsets = [0, 0], sizes = [8, 1], strides = [1, 1]} : vector<8x128xf32> to vector<8x1xf32>
    %32 = arith.subf %30, %31 : vector<8x1xf32>
    %33 = vector.extract_strided_slice %29 {offsets = [0, 3], sizes = [8, 1], strides = [1, 1]} : vector<8x128xf32> to vector<8x1xf32>
    %34 = vector.extract_strided_slice %29 {offsets = [0, 1], sizes = [8, 1], strides = [1, 1]} : vector<8x128xf32> to vector<8x1xf32>
    %35 = arith.subf %33, %34 : vector<8x1xf32>
    %36 = vector.extract_strided_slice %29 {offsets = [0, 0], sizes = [8, 1], strides = [1, 1]} : vector<8x128xf32> to vector<8x1xf32>
    %cst_22 = arith.constant 5.000000e-01 : f32
    %37 = vector.broadcast %cst_22 : f32 to vector<8x1xf32>
    %38 = arith.mulf %37, %32 : vector<8x1xf32>
    %39 = arith.addf %36, %38 : vector<8x1xf32>
    %40 = vector.extract_strided_slice %29 {offsets = [0, 1], sizes = [8, 1], strides = [1, 1]} : vector<8x128xf32> to vector<8x1xf32>
    %cst_23 = arith.constant 5.000000e-01 : f32
    %41 = vector.broadcast %cst_23 : f32 to vector<8x1xf32>
    %42 = arith.mulf %41, %35 : vector<8x1xf32>
    %43 = arith.addf %40, %42 : vector<8x1xf32>
    %44 = vector.extract_strided_slice %21 {offsets = [0, 1], sizes = [8, 1], strides = [1, 1]} : vector<8x128xf32> to vector<8x1xf32>
    %45 = vector.extract_strided_slice %21 {offsets = [0, 2], sizes = [8, 1], strides = [1, 1]} : vector<8x128xf32> to vector<8x1xf32>
    %46 = vector.extract_strided_slice %21 {offsets = [0, 3], sizes = [8, 1], strides = [1, 1]} : vector<8x128xf32> to vector<8x1xf32>
    %cst_24 = arith.constant 4.13516665 : f32
    %47 = vector.broadcast %cst_24 : f32 to vector<8x1xf32>
    %48 = arith.minimumf %46, %47 : vector<8x1xf32>
    %49 = vector.extract_strided_slice %21 {offsets = [0, 4], sizes = [8, 1], strides = [1, 1]} : vector<8x128xf32> to vector<8x1xf32>
    %cst_25 = arith.constant 4.13516665 : f32
    %50 = vector.broadcast %cst_25 : f32 to vector<8x1xf32>
    %51 = arith.minimumf %49, %50 : vector<8x1xf32>
    %52 = arith.mulf %44, %32 : vector<8x1xf32>
    %53 = arith.addf %52, %39 : vector<8x1xf32>
    %54 = arith.mulf %45, %35 : vector<8x1xf32>
    %55 = arith.addf %54, %43 : vector<8x1xf32>
    %56 = math.exp %48 : vector<8x1xf32>
    %57 = arith.mulf %56, %32 : vector<8x1xf32>
    %58 = math.exp %51 : vector<8x1xf32>
    %59 = arith.mulf %58, %35 : vector<8x1xf32>
    %c0_26 = arith.constant 0 : index
    %c5 = arith.constant 5 : index
    %60 = vector.load %arg9[%c0_26, %c5] : memref<8x128xf32, #tpu.memory_space<vmem>>, vector<8x1xf32>
    tpu.vector_store %arg9[%c0_26, %c5], %28 {strides = array<i32>} : memref<8x128xf32, #tpu.memory_space<vmem>>, vector<8x1xf32>,
    %cst_27 = arith.constant 5.000000e-01 : f32
    %61 = vector.broadcast %cst_27 : f32 to vector<8x1xf32>
    %62 = arith.mulf %61, %57 : vector<8x1xf32>
    %63 = arith.subf %53, %62 : vector<8x1xf32>
    %c0_28 = arith.constant 0 : index
    %c6 = arith.constant 6 : index
    %64 = vector.load %arg9[%c0_28, %c6] : memref<8x128xf32, #tpu.memory_space<vmem>>, vector<8x1xf32>
    tpu.vector_store %arg9[%c0_28, %c6], %63 {strides = array<i32>} : memref<8x128xf32, #tpu.memory_space<vmem>>, vector<8x1xf32>,
    %cst_29 = arith.constant 5.000000e-01 : f32
    %65 = vector.broadcast %cst_29 : f32 to vector<8x1xf32>
    %66 = arith.mulf %65, %59 : vector<8x1xf32>
    %67 = arith.subf %55, %66 : vector<8x1xf32>
    %c0_30 = arith.constant 0 : index
    %c7 = arith.constant 7 : index
    %68 = vector.load %arg9[%c0_30, %c7] : memref<8x128xf32, #tpu.memory_space<vmem>>, vector<8x1xf32>
    tpu.vector_store %arg9[%c0_30, %c7], %67 {strides = array<i32>} : memref<8x128xf32, #tpu.memory_space<vmem>>, vector<8x1xf32>,
    %cst_31 = arith.constant 5.000000e-01 : f32
    %69 = vector.broadcast %cst_31 : f32 to vector<8x1xf32>
    %70 = arith.mulf %69, %57 : vector<8x1xf32>
    %71 = arith.addf %53, %70 : vector<8x1xf32>
    %c0_32 = arith.constant 0 : index
    %c8 = arith.constant 8 : index
    %72 = vector.load %arg9[%c0_32, %c8] : memref<8x128xf32, #tpu.memory_space<vmem>>, vector<8x1xf32>
    tpu.vector_store %arg9[%c0_32, %c8], %71 {strides = array<i32>} : memref<8x128xf32, #tpu.memory_space<vmem>>, vector<8x1xf32>,
    %cst_33 = arith.constant 5.000000e-01 : f32
    %73 = vector.broadcast %cst_33 : f32 to vector<8x1xf32>
    %74 = arith.mulf %73, %59 : vector<8x1xf32>
    %75 = arith.addf %55, %74 : vector<8x1xf32>
    %c0_34 = arith.constant 0 : index
    %c9 = arith.constant 9 : index
    %76 = vector.load %arg9[%c0_34, %c9] : memref<8x128xf32, #tpu.memory_space<vmem>>, vector<8x1xf32>
    tpu.vector_store %arg9[%c0_34, %c9], %75 {strides = array<i32>} : memref<8x128xf32, #tpu.memory_space<vmem>>, vector<8x1xf32>,
    return
  }
  func.func @transform_0(%arg0: i32) -> (i32, i32) {
    %c0_i32 = arith.constant 0 : i32
    %c0_i32_0 = arith.constant 0 : i32
    return %arg0, %c0_i32 : i32, i32
  }
  func.func @transform_1(%arg0: i32) -> (i32, i32) {
    %c0_i32 = arith.constant 0 : i32
    %c0_i32_0 = arith.constant 0 : i32
    return %arg0, %c0_i32 : i32, i32
  }
  func.func @transform_2(%arg0: i32) -> (i32, i32) {
    %c0_i32 = arith.constant 0 : i32
    %c0_i32_0 = arith.constant 0 : i32
    %c0_i32_1 = arith.constant 0 : i32
    return %c0_i32, %c0_i32_0 : i32, i32
  }
  func.func @transform_3(%arg0: i32) -> (i32, i32) {
    %c0_i32 = arith.constant 0 : i32
    %c0_i32_0 = arith.constant 0 : i32
    %c0_i32_1 = arith.constant 0 : i32
    return %c0_i32, %c0_i32_0 : i32, i32
  }
  func.func @transform_4(%arg0: i32) -> (i32, i32) {
    %c0_i32 = arith.constant 0 : i32
    %c0_i32_0 = arith.constant 0 : i32
    %c0_i32_1 = arith.constant 0 : i32
    return %c0_i32, %c0_i32_0 : i32, i32
  }
  func.func @transform_5(%arg0: i32) -> (i32, i32) {
    %c0_i32 = arith.constant 0 : i32
    %c0_i32_0 = arith.constant 0 : i32
    %c0_i32_1 = arith.constant 0 : i32
    return %c0_i32, %c0_i32_0 : i32, i32
  }
  func.func @transform_6(%arg0: i32) -> (i32, i32) {
    %c0_i32 = arith.constant 0 : i32
    %c0_i32_0 = arith.constant 0 : i32
    %c0_i32_1 = arith.constant 0 : i32
    return %c0_i32, %c0_i32_0 : i32, i32
  }
  func.func @transform_7(%arg0: i32) -> (i32, i32) {
    %c0_i32 = arith.constant 0 : i32
    %c0_i32_0 = arith.constant 0 : i32
    %c0_i32_1 = arith.constant 0 : i32
    return %c0_i32, %c0_i32_0 : i32, i32
  }
  func.func @transform_8(%arg0: i32) -> (i32, i32) {
    %c0_i32 = arith.constant 0 : i32
    %c0_i32_0 = arith.constant 0 : i32
    return %arg0, %c0_i32 : i32, i32
  }
}

</mosaic_0001>

<bundles_post_ra>
// kernel: _device_forward.1
= control target key start
LH: loop header
LB: loop body
LE: loop exit
PB: predicated region body
PF: predicated region fallthrough
CT: control target
= control target key end

     0   :  { %s1108_s27 = smov 0   ;;  %s1266_s0 = inlined_call_operand.vmem [shape: bf16[16,256], index: 0, kind: input, shape index: {}]   ;;  %s1267_s1 = inlined_call_operand.vmem [shape: f32[16,128], index: 1, kind: input, shape index: {}]   ;;  %s1268_s2 = inlined_call_operand.vmem [shape: bf16[256,128], index: 2, kind: input, shape index: {}]   ;;  %s1269_s3 = inlined_call_operand.vmem [shape: f32[1,128], index: 3, kind: input, shape index: {}]   ;;  %s1270_s4 = inlined_call_operand.vmem [shape: bf16[128,128], index: 4, kind: input, shape index: {}]   ;;  %s1271_s5 = inlined_call_operand.vmem [shape: f32[1,128], index: 5, kind: input, shape index: {}]   ;;  %s1272_s6 = inlined_call_operand.vmem [shape: bf16[128,128], index: 6, kind: input, shape index: {}]   ;;  %s1273_s7 = inlined_call_operand.vmem [shape: f32[1,128], index: 7, kind: input, shape index: {}]   ;;  %s1274_s8 = inlined_call_operand.vmem [shape: f32[16,128], index: 8, kind: output, shape index: {}]  }
   0x1 LB: > { %s861_s28 = sadd.s32 4294967295, %s1053_s27   ;;  %p865_p0 = scmp.ge.s32.totalorder %s1053_s27, 1  ;;  %s1053_s27 = sphi %s1108_s27, %s18_s27  }
   0x2   : > { %p271_p1 = scmp.lt.s32.totalorder %s1053_s27, 3 }
   0x4   : > { %p272_p2 = pnand %p865_p0, %p271_p1 }
   0x5   : > { %v1007_v0 = vld [vmem:[%s1268_s2 + $0x40] sm:$0xff] (!%p272_p2)   ;;  %v1009_v2 = vld [vmem:[%s1268_s2 + $0x48] sm:$0xff] (!%p272_p2)   ;;  %p308_p3 = scmp.lt.s32.totalorder (!%p272_p2), %s861_s28, 1  ;;  %v1055_v3 = vmov (!%p272_p2), 0.0   ;;  %v1011_v5 = vld [vmem:[%s1268_s2 + $0x50] sm:$0xff] (!%p272_p2)   ;;  %vm1056_vm0 = vmmov (!%p272_p2), 0  }
   0x6   : > { %275 = sbr.rel (%p272_p2) target bundleno = 946 (0x3b2), region = 52  ;;  %v1008_v1 = vld [vmem:[%s1268_s2] sm:$0xff] (!%p272_p2)   ;;  %911 = vmatprep.subr.bf16.mxu0 (!%p272_p2), %v1007_v0  ;;  %951 = vmatprep.subr.bf16.mxu1 (!%p272_p2), %v1055_v3  ;;  %v1010_v4 = vld [vmem:[%s1268_s2 + $0x8] sm:$0xff] (!%p272_p2)   ;;  %v1012_v6 = vld [vmem:[%s1268_s2 + $0x10] sm:$0xff] (!%p272_p2)   ;;  %s1057_s24 = smov (!%p272_p2), 2   ;;  %vm771_vm1 = vcmask (!%p272_p2), 48168  }
   0x7   : > { %912 = vmatpush3.bf16.msra.mxu0 (!%p272_p2), %v1008_v1  ;;  %v1013_v7 = vld [vmem:[%s1268_s2 + $0x58] sm:$0xff] (!%p272_p2)   ;;  %v1015_v9 = vld [vmem:[%s1268_s2 + $0x60] sm:$0xff] (!%p272_p2)   ;;  %v1017_v11 = vld [vmem:[%s1268_s2 + $0x68] sm:$0xff] (!%p272_p2)   ;;  %967 = vmatprep.mubr.msk.bf16.mxu1 (!%p272_p2), %vm1056_vm0, %v1055_v3  ;;  %s1058_s16 = smov (!%p272_p2), 126   ;;  %s1059_s22 = smov (!%p272_p2), 1   ;;  %vm783_vm2 = vcmask (!%p272_p2), 56368  }
   0x8   : > { %913 = vmatprep.subr.bf16.mxu0 (!%p272_p2), %v1009_v2  ;;  %v1014_v8 = vld [vmem:[%s1268_s2 + $0x18] sm:$0xff] (!%p272_p2)   ;;  %v1016_v10 = vld [vmem:[%s1268_s2 + $0x20] sm:$0xff] (!%p272_p2)   ;;  %v1018_v15 = vld [vmem:[%s1268_s2 + $0x28] sm:$0xff] (!%p272_p2)   ;;  %s1060_s23 = smov (!%p272_p2), 127   ;;  %vm785_vm3 = vcmask (!%p272_p2), 64568   ;;  %vm792_vm4 = vcmask (!%p272_p2), 72768  }
   0x9   : > { %v1025_v14 = vld [vmem:[%s1270_s4] sm:$0xff] (!%p272_p2)   ;;  %v1019_v16 = vld [vmem:[%s1268_s2 + $0x70] sm:$0xff] (!%p272_p2)   ;;  %v1026_v17 = vld [vmem:[%s1270_s4 + $0x8] sm:$0xff] (!%p272_p2)   ;;  %vm794_vm5 = vcmask (!%p272_p2), 80968  }
   0xa   : > { %952 = vmatpush3.bf16.msra.mxu1 (!%p272_p2), %v1025_v14  ;;  %v1020_v18 = vld [vmem:[%s1268_s2 + $0x30] sm:$0xff] (!%p272_p2)   ;;  %v1021_v19 = vld [vmem:[%s1268_s2 + $0x78] sm:$0xff] (!%p272_p2)   ;;  %v1029_v24 = vld [vmem:[%s1270_s4 + $0x20] sm:$0xff] (!%p272_p2)  }
   0xb   : > { %914 = vmatpush3.bf16.msra.mxu0 (!%p272_p2), %v1010_v4  ;;  %953 = vmatprep.subr.bf16.mxu1 (!%p272_p2), %v1055_v3  ;;  %v1027_v20 = vld [vmem:[%s1270_s4 + $0x10] sm:$0xff] (!%p272_p2)   ;;  %v1022_v21 = vld [vmem:[%s1268_s2 + $0x38] sm:$0xff] (!%p272_p2)   ;;  %v1030_v25 = vld [vmem:[%s1270_s4 + $0x28] sm:$0xff] (!%p272_p2)  }
   0xc   : > { %915 = vmatprep.subr.bf16.mxu0 (!%p272_p2), %v1011_v5  ;;  %v1028_v22 = vld [vmem:[%s1270_s4 + $0x18] sm:$0xff] (!%p272_p2)   ;;  %v1031_v26 = vld [vmem:[%s1270_s4 + $0x30] sm:$0xff] (!%p272_p2)   ;;  %v1033_v28 = vld [vmem:[%s1272_s6] sm:$0xff] (!%p272_p2)  }
   0xd   : > { %s1276_s28 = smov (!%p308_p3, %s861_s28), 1  ;;  %v1032_v27 = vld [vmem:[%s1270_s4 + $0x38] sm:$0xff]   ;;  %v1034_v30 = vld [vmem:[%s1272_s6 + $0x8] sm:$0xff]   ;;  %v1035_v31 = vld [vmem:[%s1272_s6 + $0x10] sm:$0xff]  }
   0xe   : > { %s1138_s21 = sshll.u32 %s1276_s28, 3  ;;  %954 = vmatpush3.bf16.msra.mxu1 %v1026_v17  ;;  %v1036_v32 = vld [vmem:[%s1272_s6 + $0x18] sm:$0xff]   ;;  %v1037_v33 = vld [vmem:[%s1272_s6 + $0x20] sm:$0xff]   ;;  %v1038_v34 = vld [vmem:[%s1272_s6 + $0x28] sm:$0xff]   ;;  %s1062_s28 = smov 7  }
   0xf   : > { %916 = vmatpush3.bf16.msra.mxu0 %v1012_v6  ;;  %s312_s30 = scalar_lea.vmem %s1266_s0, %s1138_s21  ;;  %955 = vmatprep.subr.bf16.mxu1 %v1055_v3  ;;  %s316_s20 = scalar_lea.vmem %s1267_s1, %s1138_s21  ;;  %v870_v38 = vld [vmem:[%s1269_s3] ss:$0 sm:$0xff]  ;;  %v1039_v47 = vld [vmem:[%s1272_s6 + $0x30] sm:$0xff]   ;;  %v1040_v48 = vld [vmem:[%s1272_s6 + $0x38] sm:$0xff]  }
  0x10   : > { %917 = vmatprep.subr.bf16.mxu0 %v1013_v7  ;;  %v322_v12 = vld [vmem:[%s312_s30] sm:$0xff]  ;;  %s1254_s10 = scalar_lea.vmem %s1274_s8, %s1138_s21  ;;  %s1061_s21 = smov 5  }
  0x11   : > { %v872_v13 = vcombine.high %v322_v12, %v322_v12  ;;  %v871_v23 = vcombine.low %v322_v12, %v322_v12  ;;  %v738_v29 = vld [vmem:[%s316_s20] sm:$0xff] }
  0x12   : > { %956 = vmatpush3.bf16.msra.mxu1 %v1027_v20  ;;  %740 = vrot.lane.b32.xlu0 %v738_v29, %s1057_s24  ;;  %v889_v51 = vld [vmem:[%s1271_s5] ss:$0 sm:$0xff] }
  0x13   : > { %918 = vmatpush3.bf16.msra.mxu0 %v1014_v8  ;;  %497 = vmatprep.mubr.bf16.mxu0 %v872_v13  ;;  %v898_v59 = vld [vmem:[%s1273_s7] ss:$0 sm:$0xff] }
  0x14   : > { %919 = vmatprep.subr.bf16.mxu0 %v1015_v9  ;;  %957 = vmatprep.subr.bf16.mxu1 %v1055_v3 }
  0x16   : > { %958 = vmatpush3.bf16.msra.mxu1 %v1028_v22 }
  0x17   : > { %920 = vmatpush3.bf16.msra.mxu0 %v1016_v10  ;;  %959 = vmatprep.subr.bf16.mxu1 %v1055_v3 }
  0x18   : > { %921 = vmatprep.subr.bf16.mxu0 %v1017_v11 }
  0x1a   : > { %960 = vmatpush3.bf16.msra.mxu1 %v1029_v24 }
  0x1b   : > { %922 = vmatpush3.bf16.msra.mxu0 %v1018_v15  ;;  %961 = vmatprep.subr.bf16.mxu1 %v1055_v3 }
  0x1c   : > { %923 = vmatprep.subr.bf16.mxu0 %v1019_v16 }
  0x1e   : > { %962 = vmatpush3.bf16.msra.mxu1 %v1030_v25 }
  0x1f   : > { %924 = vmatpush3.bf16.msra.mxu0 %v1020_v18  ;;  %963 = vmatprep.subr.bf16.mxu1 %v1055_v3 }
  0x20   : > { %925 = vmatprep.subr.bf16.mxu0 %v1021_v19 }
  0x22   : > { %964 = vmatpush3.bf16.msra.mxu1 %v1031_v26 }
  0x23   : > { %926 = vmatpush3.bf16.msra.mxu0 %v1022_v21  ;;  %965 = vmatprep.subr.bf16.mxu1 %v1055_v3 }
  0x24   : > { %971 = vmatprep.subr.bf16.mxu0 %v1055_v3 }
  0x26   : > { %498 = vmatmul.mubr.bf16.vlgmr.msra.gmra.mrb[0].mxu0 %v871_v23  ;;  %966 = vmatpush3.bf16.msra.mxu1 %v1032_v27 }
  0x27   : > { %987 = vmatprep.mubr.msk.bf16.mxu0 %vm1056_vm0, %v1055_v3  ;;  %972 = vmatpush3.bf16.msra.mxu0 %v1033_v28 }
  0x28   : > { %973 = vmatprep.subr.bf16.mxu0 %v1055_v3 }
  0x2b   : > { %974 = vmatpush3.bf16.msra.mxu0 %v1034_v30 }
  0x2c   : > { %975 = vmatprep.subr.bf16.mxu0 %v1055_v3 }
  0x2f   : > { %976 = vmatpush3.bf16.msra.mxu0 %v1035_v31 }
  0x30   : > { %977 = vmatprep.subr.bf16.mxu0 %v1055_v3 }
  0x33   : > { %978 = vmatpush3.bf16.msra.mxu0 %v1036_v32 }
  0x34   : > { %979 = vmatprep.subr.bf16.mxu0 %v1055_v3 }
  0x37   : > { %980 = vmatpush3.bf16.msra.mxu0 %v1037_v33 }
  0x38   : > { %981 = vmatprep.subr.bf16.mxu0 %v1055_v3 }
  0x3b   : > { %982 = vmatpush3.bf16.msra.mxu0 %v1038_v34 }
  0x3c   : > { %983 = vmatprep.subr.bf16.mxu0 %v1055_v3 }
  0x3f   : > { %984 = vmatpush3.bf16.msra.mxu0 %v1039_v47 }
  0x40   : > { %985 = vmatprep.subr.bf16.mxu0 %v1055_v3 }
  0x43   : > { %986 = vmatpush3.bf16.msra.mxu0 %v1040_v48 }
  0x84   : > { %v741_v35 = vpop.permute.xlu0 %740 }
  0x85   : > { %v743_v36 = vsub.f32 %v738_v29, %v741_v35 }
  0x87   : > { %v744_v40 = vmul.f32 0.5, %v743_v36  ;;  %763 = vrot.lane.b32.xlu1 %v743_v36, %s1059_s22 }
  0x89   : > { %746 = vrot.lane.b32.xlu0 %v744_v40, %s1058_s16 }
  0x8b   : > { %752 = vrot.lane.b32.xlu1 %v743_v36, %s1060_s23 }
  0xf9   : > { %v927_v37 = vpop.f32.mrb[0].mxu0  ;;  %v764_v7 = vpop.permute.xlu1 %763 }
  0xfa   : > { %v928_v39 = vpop.f32.mrb[1].mxu0 }
  0xfb   : > { %v929_v41 = vadd.f32 %v928_v39, %v927_v37  ;;  %v930_v42 = vpop.f32.mrb[2].mxu0  ;;  %v747_v49 = vpop.permute.xlu0 %746 }
  0xfc   : > { %v931_v43 = vpop.f32.mrb[3].mxu0  ;;  %v749_v50 = vadd.f32 %v747_v49, %v738_v29 }
  0xfd   : > { %v500_v44 = vadd.f32 %v929_v41, %v870_v38  ;;  %v753_v11 = vpop.permute.xlu1 %752 }
  0xfe   : > { %757 = vrot.lane.b32.xlu0 %v749_v50, %s1059_s22 }
  0xff   : > { %v505_v45 = vmax.f32 %v500_v44, 0.0 }
 0x101   : > { %v506_v46 = vpack.c.bf16 %v505_v45, %v505_v45 }
 0x103   : > { %968 = vmatmul.mubr.bf16.vlgmr.msra.gmra.mrb[0].mxu1 %v506_v46 }
 0x170   : > { %v758_v13 = vpop.permute.xlu0 %757 }
 0x1d6   : > { %v612_v52 = vpop.f32.mrb[0].mxu1 }
 0x1d7   : > { %v613_v53 = vadd.f32 %v889_v51, %v612_v52  ;;  %v969_v54 = vpop.f32.mrb[1].mxu1 }
 0x1d8   : > { %v615_v55 = vpop.f32.mrb[2].mxu1 }
 0x1d9   : > { %v618_v56 = vmax.f32 %v613_v53, 0.0  ;;  %v970_v57 = vpop.f32.mrb[3].mxu1 }
 0x1db   : > { %v619_v58 = vpack.c.bf16 %v618_v56, %v618_v56 }
 0x1dd   : > { %988 = vmatmul.mubr.bf16.vlgmr.msra.gmra.mrb[4].mxu0 %v619_v58 }
 0x2b0   : > { %v725_v60 = vpop.f32.mrb[4].mxu0 }
 0x2b1   : > { %v726_v61 = vadd.f32 %v898_v59, %v725_v60  ;;  %v989_v62 = vpop.f32.mrb[5].mxu0 }
 0x2b2   : > { %v728_v63 = vpop.f32.mrb[6].mxu0 }
 0x2b3   : > { %v907_v0 = vmul.f32 -1.442695, %v726_v61  ;;  %v750_v1 = vmin.f32 %v726_v61, 4.1351666  ;;  %731 = vst [vmem:[%s1254_s10] sm:$0xff] %v726_v61  ;;  %v990_v2 = vpop.f32.mrb[7].mxu0  ;;  %v755_v12 = vmul.f32 %v753_v11, %v726_v61 }
 0x2b5   : > { %1041 = vpow2.f32 %v907_v0  ;;  %v761_v3 = vmul.f32 1.442695, %v750_v1  ;;  %v760_v14 = vadd.f32 %v758_v13, %v755_v12 }
 0x2b7   : > { %1043 = vpow2.f32 %v761_v3 }
 0x2bf   : > { %v1042_v4 = vpop.eup %1041 }
 0x2c0   : > { %v735_v5 = vadd.f32 1.0, %v1042_v4 }
 0x2c1   : > { %v1044_v6 = vpop.eup %1043 }
 0x2c2   : > { %1045 = vrcp.f32 %v735_v5  ;;  %v766_v8 = vmul.f32 %v1044_v6, %v764_v7 }
 0x2c4   : > { %v773_v9 = vmul.f32 0.5, %v766_v8 }
 0x2c6   : > { %775 = vrot.lane.b32.xlu1 %v773_v9, %s1058_s16 }
 0x2cc   : > { %v1046_v10 = vpop.eup %1045 }
 0x2cd   : > { %768 = vrot.lane.b32.xlu0 %v1046_v10, %s1061_s21 }
 0x338   : > { %v776_v15 = vpop.permute.xlu1 %775 }
 0x339   : > { %v778_v16 = vsub.f32 %v760_v14, %v776_v15  ;;  %v787_v17 = vadd.f32 %v776_v15, %v760_v14 }
 0x33b   : > { %780 = vrot.lane.b32.xlu1 %v778_v16, %s1061_s21  ;;  %789 = vrot.lane.b32.xlu0 %v787_v17, %s1062_s28 }
 0x33f   : > { %v769_v18 = vpop.permute.xlu0 %768 }
 0x340   : > { %772 = vst.msk [vmem:[%s1254_s10] sm:$0xff] %vm771_vm1, %v769_v18 }
 0x3ad   : > { %v781_v19 = vpop.permute.xlu1 %780  ;;  %v790_v20 = vpop.permute.xlu0 %789 }
 0x3ae   : > { %784 = vst.msk [vmem:[%s1254_s10] sm:$0xff] %vm783_vm2, %v781_v19 }
 0x3af   : > { %786 = vst.msk [vmem:[%s1254_s10] sm:$0xff] %vm785_vm3, %v781_v19 }
 0x3b0   : > { %793 = vst.msk [vmem:[%s1254_s10] sm:$0xff] %vm792_vm4, %v790_v20 }
 0x3b1   : > { %795 = vst.msk [vmem:[%s1254_s10] sm:$0xff] %vm794_vm5, %v790_v20 }
 0x3b2 PF: > { %s18_s27 = sadd.s32 1, %s1053_s27  }
 0x3b3   : > { %p15_p4 = scmp.ge.s32.totalorder %s18_s27, 4  }
 0x3b5   :  { %17 = sbr.rel (!%p15_p4) target bundleno = 1 (0x1), region = 85 }

</bundles_post_ra>
